<compile_context>
chip_gen: v7x
topology: tpu7x:2x2x1
jax: 0.10.0
libtpu: 0.0.40
codegen_flags: <defaults>
</compile_context>

<pallas_src>
import jax
import jax.numpy as jnp
from jax.experimental import pallas as pl
from jax.experimental.pallas import tpu as pltpu


def _solu_kernel(x_ref, o_ref):
    # x_ref/o_ref: (row_tile, H) tiles in VMEM; softmax axis == lane axis.
    x = x_ref[...].astype(jnp.float32)
    m = jnp.max(x, axis=-1, keepdims=True)
    e = jnp.exp(x - m)
    s = jnp.sum(e, axis=-1, keepdims=True)
    inv = 1.0 / s  # exact per-row reciprocal; ~rt ops total, negligible
    o_ref[...] = (x * e * inv).astype(o_ref.dtype)


def _vmem_capacity_bytes() -> int:
    """Physical VMEM per core (128 MiB v5e/v6e, 64 MiB v7x); conservative default."""
    try:
        return int(pltpu.get_tpu_info().vmem_capacity_bytes)
    except Exception:
        return 64 << 20  # assume v7x (smallest) if the query is unavailable


def _pick_row_tile(n_rows: int, hidden: int, itemsize: int, vmem_bytes: int) -> int:
    """Row tile sized toward the ~1-4 MiB-per-block sweet spot.

    - Rounded to dtype-packed sublane multiples (8 f32 / 16 bf16 / 32 int8).
    - Never shrunk below ~1 MiB just to create more grid blocks (single-TC
      v5e/v6e gain nothing from extra blocks; each costs ~0.35 us overhead).
    - On narrow-VMEM parts (64 MiB, v7x proxy) with sub-32-bit inputs the I/O
      block is capped smaller since the f32 temporaries dominate, and we aim
      for >=4 blocks so both TensorCores get work under the parallel axis.
    """
    sub = max(8, 32 // max(itemsize, 1))          # sublane multiple per dtype
    row_bytes = max(hidden * itemsize, 1)

    is_narrow_vmem = vmem_bytes <= (64 << 20)     # v7x proxy (64 MiB, 2 TCs)
    per_buf_cap = (2 << 20) if (is_narrow_vmem and itemsize < 4) else (4 << 20)
    per_buf = min(vmem_bytes // 16, per_buf_cap)

    rt = (min(per_buf // row_bytes, 4096) // sub) * sub
    rt = max(sub, rt)
    r_ceil = pl.cdiv(n_rows, sub) * sub
    rt = min(rt, r_ceil)

    # Floor: keep blocks >= ~1 MiB.
    min_rt = max(sub, ((1 << 20) // row_bytes // sub) * sub)

    # Prefer >=2 blocks (>=4 on 2-TC v7x) only when the floor allows it.
    target_blocks = 4 if is_narrow_vmem else 2
    if rt > min_rt and pl.cdiv(r_ceil, rt) < target_blocks:
        rt = max(min_rt, (pl.cdiv(r_ceil, target_blocks) // sub) * sub)
    return rt


def solu(x: jax.Array) -> jax.Array:
    """x: (..., H). Returns x * softmax(x, axis=-1), same shape/dtype."""
    orig_shape = x.shape
    H = orig_shape[-1]
    R = 1
    for d in orig_shape[:-1]:
        R *= d

    # Lane-dense guard: for tiny / ragged hidden dims the kernel would be all
    # masked-store overhead — let XLA fuse it instead.
    if H < 128 or H % 128 != 0 or R == 0:
        return _solu_ref(x)

    itemsize = jnp.dtype(x.dtype).itemsize
    vmem_bytes = _vmem_capacity_bytes()
    rt = _pick_row_tile(R, H, itemsize, vmem_bytes)
    if rt >= R:
        # Single block covering the whole array: block_shape == full array dims
        # is always legal, even when R is not a sublane multiple.
        rt = R
    grid = pl.cdiv(R, rt)
    # If rt < R, rt is a sublane multiple so the BlockSpec satisfies the (8,128)
    # rule; any partial edge block is read/write-masked by Pallas (garbage in
    # discarded rows never crosses rows: all reductions are along the last axis).

    x2 = x.reshape(R, H)

    # VMEM budget: double-buffered in+out blocks plus ~5 live f32 temporaries,
    # with headroom, clamped a few MiB below physical capacity.
    block_bytes = rt * H * itemsize
    f32_block = rt * H * 4
    needed = 2 * 2 * block_bytes + 5 * f32_block + (2 << 20)
    vmem_limit = int(min(max(vmem_bytes - (4 << 20), 16 << 20),
                         max(needed, 16 << 20)))

    cost = pl.CostEstimate(
        flops=5 * R * H,
        transcendentals=R * H,
        bytes_accessed=2 * R * H * itemsize,
    )

    out2 = pl.pallas_call(
        _solu_kernel,
        out_shape=jax.ShapeDtypeStruct((R, H), x.dtype),
        grid_spec=pltpu.PrefetchScalarGridSpec(
            num_scalar_prefetch=0,
            grid=(grid,),
            in_specs=[pl.BlockSpec((rt, H), lambda i: (i, 0))],
            out_specs=pl.BlockSpec((rt, H), lambda i: (i, 0)),
        ),
        compiler_params=pltpu.CompilerParams(
            dimension_semantics=("parallel",),
            vmem_limit_bytes=vmem_limit,
        ),
        cost_estimate=cost,
    )(x2)

    return out2.reshape(orig_shape)


def _solu_ref(x):
    xf = x.astype(jnp.float32)
    return (xf * jax.nn.softmax(xf, axis=-1)).astype(x.dtype)


if __name__ == "__main__":
    key = jax.random.PRNGKey(0)

    # Lane-dense case through the Pallas kernel: batch=2, seq=8, hidden=256.
    x = jax.random.normal(key, (2, 8, 256), dtype=jnp.float32)
    out = jax.block_until_ready(solu(x))
    ref = _solu_ref(x)
    assert out.shape == x.shape and out.dtype == x.dtype
    assert jnp.allclose(out, ref, atol=1e-4, rtol=1e-4), "mismatch vs reference"

    # Ragged row count (R=15, not a sublane multiple) -> single full-array block.
    x_r = jax.random.normal(jax.random.PRNGKey(1), (3, 5, 256), dtype=jnp.float32)
    out_r = jax.block_until_ready(solu(x_r))
    assert jnp.allclose(out_r, _solu_ref(x_r), atol=1e-4, rtol=1e-4), "ragged mismatch"

    # Tiny hidden dim (H=32 < lane width): takes the XLA fallback path.
    x_s = jax.random.normal(jax.random.PRNGKey(2), (2, 8, 32), dtype=jnp.float32)
    out_s = jax.block_until_ready(solu(x_s))
    assert jnp.allclose(out_s, _solu_ref(x_s), atol=1e-5, rtol=1e-5), "small-H mismatch"

    print("KERNEL_OK")
</pallas_src>

<mosaic_0001>
module attributes {stable_mosaic.version = 11 : i64} {
  func.func @_solu_kernel(%arg0: i32, %arg1: memref<16x256xf32, #tpu.memory_space<vmem>>, %arg2: memref<16x256xf32, #tpu.memory_space<vmem>>) attributes {dimension_semantics = [#tpu.dimension_semantics<parallel>], iteration_bounds = array<i64: 1>, scalar_prefetch = 0 : i64, scratch_operands = 0 : i64, tpu.core_type = #tpu.core_type<tc>, window_params = [{transform_indices = @transform_0, window_bounds = array<i64: 16, 256>}, {transform_indices = @transform_1, window_bounds = array<i64: 16, 256>}]} {
    %c0 = arith.constant 0 : index
    %c0_0 = arith.constant 0 : index
    %0 = vector.load %arg1[%c0, %c0_0] : memref<16x256xf32, #tpu.memory_space<vmem>>, vector<16x256xf32>
    %cst = arith.constant dense<0xFF800000> : vector<16xf32>
    %1 = vector.multi_reduction <maximumf>, %0, %cst [1] : vector<16x256xf32> to vector<16xf32>
    %2 = vector.shape_cast %1 : vector<16xf32> to vector<16x1xf32>
    %3 = vector.broadcast %2 : vector<16x1xf32> to vector<16x256xf32>
    %4 = arith.subf %0, %3 : vector<16x256xf32>
    %5 = math.exp %4 : vector<16x256xf32>
    %cst_1 = arith.constant dense<0.000000e+00> : vector<16xf32>
    %6 = vector.multi_reduction <add>, %5, %cst_1 [1] : vector<16x256xf32> to vector<16xf32>
    %7 = vector.shape_cast %6 : vector<16xf32> to vector<16x1xf32>
    %cst_2 = arith.constant 1.000000e+00 : f32
    %8 = vector.broadcast %cst_2 : f32 to vector<16x1xf32>
    %9 = arith.divf %8, %7 : vector<16x1xf32>
    %10 = arith.mulf %0, %5 : vector<16x256xf32>
    %11 = vector.broadcast %9 : vector<16x1xf32> to vector<16x256xf32>
    %12 = arith.mulf %10, %11 : vector<16x256xf32>
    %c0_3 = arith.constant 0 : index
    %c0_4 = arith.constant 0 : index
    %13 = vector.load %arg2[%c0_3, %c0_4] : memref<16x256xf32, #tpu.memory_space<vmem>>, vector<16x256xf32>
    tpu.vector_store %arg2[%c0_3, %c0_4], %12 {strides = array<i32>} : memref<16x256xf32, #tpu.memory_space<vmem>>, vector<16x256xf32>,
    return
  }
  func.func @transform_0(%arg0: i32) -> (i32, i32) {
    %c0_i32 = arith.constant 0 : i32
    %c0_i32_0 = arith.constant 0 : i32
    return %arg0, %c0_i32 : i32, i32
  }
  func.func @transform_1(%arg0: i32) -> (i32, i32) {
    %c0_i32 = arith.constant 0 : i32
    %c0_i32_0 = arith.constant 0 : i32
    return %arg0, %c0_i32 : i32, i32
  }
}

</mosaic_0001>

<bundles_post_ra>
// kernel: tpu_custom_call.1
= control target key start
LH: loop header
LB: loop body
LE: loop exit
PB: predicated region body
PF: predicated region fallthrough
CT: control target
= control target key end

     0   :  { %6 = vsyncpa [#allocation3], 0  ;;  %s192_s0 = inlined_call_operand.hbm [shape: f32[16,256], index: 0, kind: input, shape index: {}]   ;;  %s193_s1 = inlined_call_operand.hbm [shape: f32[16,256], index: 1, kind: output, shape index: {}]  }
   0x1   :  { %7 = vsyncpa [#allocation4], 0  ;;  %s148_s6 = smov [#allocation2]   ;;  %s100_s10 = scalar_lea.hbm %s192_s0, 512 }
   0x2   :  { %s13_s7 = sshll.u32 %s148_s6, 4  ;;  %p101_p0 = scmp.ne.s32.totalorder %s192_s0, %s100_s10  ;;  %s14_s7 = int_to_ptr.vmem [resolvable:$true] %s13_s7 }
   0x3   :  { %p104_p1 = scmp.lt.u32.totalorder %s100_s10, %s192_s0 }
   0x5   :  { %p106_p2 = pnand %p104_p1, %p101_p0 }
   0x7   :  { %109 = shalt.err (!%p106_p2)
}
   0x8   :  { %s110_s15 = scalar_lea.vmem %s14_s7, 512  ;;  %p115_p4 = scmp.lt.s32.totalorder %s14_s7, %s14_s7 }
   0x9   :  { %p111_p3 = scmp.ne.s32.totalorder %s14_s7, %s110_s15  ;;  %p116_p5 = scmp.lt.s32.totalorder %s110_s15, %s110_s15 }
   0xb   :  { %p117_p6 = por %p116_p5, %p115_p4 }
   0xd   :  { %p118_p7 = pnand %p117_p6, %p111_p3 }
   0xf   :  { %121 = shalt.err (!%p118_p7)
}
  0x10   :  { %s149_s16 = smov 256   ;;  %s150_s17 = smov 16  }
  0x11   :  { %19 = dma.hbm_to_vmem [thread:$0]  %s192_s0, 512, %s14_s7, [#allocation3], %s149_s16, %s149_s16, %s150_s17  }
  0x12   :  { %144 = dma.done.wait [#allocation3], 512  }
  0x13   :  { %145 = vsyncadd [#allocation3], 4294966784  ;;  %v23_v0 = vld [vmem:[#allocation2] sm:$0xff]  ;;  %v24_v1 = vld [vmem:[#allocation2 + $0x8] sm:$0xff]  ;;  %s151_s0 = smov [#allocation5]  }
  0x14   :  { %v25_v2 = vld [vmem:[#allocation2 + $0x10] sm:$0xff]  ;;  %v27_v3 = vmax.f32 %v23_v0, %v24_v1  ;;  %v26_v4 = vld [vmem:[#allocation2 + $0x18] sm:$0xff]  ;;  %s72_s20 = sshll.u32 %s151_s0, 4  ;;  %s73_s20 = int_to_ptr.vmem [resolvable:$true] %s72_s20 }
  0x15   :  { %v30_v5 = vmax.f32 %v25_v2, %v26_v4  ;;  %s122_s21 = scalar_lea.vmem %s73_s20, 512  ;;  %p127_p9 = scmp.lt.s32.totalorder %s73_s20, %s73_s20 }
  0x16   :  { %28 = vmax.xlane.f32.xlu0 %v27_v3  ;;  %p123_p8 = scmp.ne.s32.totalorder %s73_s20, %s122_s21  ;;  %p128_p10 = scmp.lt.s32.totalorder %s122_s21, %s122_s21 }
  0x18   :  { %p129_p11 = por %p128_p10, %p127_p9 }
  0x1a   :  { %31 = vmax.xlane.f32.xlu0 %v30_v5  ;;  %p130_p12 = pnand %p129_p11, %p123_p8 }
  0xa3   :  { %v29_v6 = vpop.xlane.xlu0 %28 }
  0xa4   :  { %v33_v7 = vsub.f32 %v23_v0, %v29_v6  ;;  %v34_v8 = vsub.f32 %v24_v1, %v29_v6 }
  0xa6   :  { %v37_v9 = vmul.f32 1.442695, %v33_v7  ;;  %v39_v10 = vmul.f32 1.442695, %v34_v8 }
  0xa7   :  { %v32_v11 = vpop.xlane.xlu0 %31 }
  0xa8   :  { %88 = vpow2.f32 %v37_v9  ;;  %v35_v12 = vsub.f32 %v25_v2, %v32_v11  ;;  %v36_v13 = vsub.f32 %v26_v4, %v32_v11 }
  0xa9   :  { %90 = vpow2.f32 %v39_v10 }
  0xaa   :  { %v41_v14 = vmul.f32 1.442695, %v35_v12  ;;  %v43_v15 = vmul.f32 1.442695, %v36_v13 }
  0xac   :  { %92 = vpow2.f32 %v41_v14 }
  0xad   :  { %94 = vpow2.f32 %v43_v15 }
  0xb2   :  { %v89_v16 = vpop.eup %88 }
  0xb3   :  { %v91_v17 = vpop.eup %90  ;;  %v55_v24 = vmul.f32 %v89_v16, %v23_v0 }
  0xb4   :  { %v45_v18 = vadd.f32 %v91_v17, %v89_v16  ;;  %v56_v25 = vmul.f32 %v91_v17, %v24_v1 }
  0xb6   :  { %v93_v19 = vpop.eup %92  ;;  %46 = vadd.xlane.f32.xlu1 %v45_v18 }
  0xb7   :  { %v95_v20 = vpop.eup %94  ;;  %v57_v29 = vmul.f32 %v93_v19, %v25_v2 }
  0xb8   :  { %v48_v21 = vadd.f32 %v95_v20, %v93_v19  ;;  %v58_v30 = vmul.f32 %v95_v20, %v26_v4 }
  0xba   :  { %49 = vadd.xlane.f32.xlu1 %v48_v21 }
 0x143   :  { %v47_v22 = vpop.xlane.xlu1 %46 }
 0x144   :  { %96 = vrcp.f32 %v47_v22 }
 0x147   :  { %v50_v23 = vpop.xlane.xlu1 %49 }
 0x148   :  { %98 = vrcp.f32 %v50_v23 }
 0x14e   :  { %v97_v26 = vpop.eup %96 }
 0x14f   :  { %v59_v27 = vmul.f32 %v97_v26, %v55_v24  ;;  %v60_v28 = vmul.f32 %v97_v26, %v56_v25 }
 0x151   :  { %63 = vst [vmem:[#allocation5] sm:$0xff] %v59_v27  ;;  %64 = vst [vmem:[#allocation5 + $0x8] sm:$0xff] %v60_v28 }
 0x152   :  { %v99_v31 = vpop.eup %98 }
 0x153   :  { %v61_v32 = vmul.f32 %v99_v31, %v57_v29  ;;  %v62_v33 = vmul.f32 %v99_v31, %v58_v30 }
 0x155   :  { %65 = vst [vmem:[#allocation5 + $0x10] sm:$0xff] %v61_v32  ;;  %66 = vst [vmem:[#allocation5 + $0x18] sm:$0xff] %v62_v33 }
 0x156   :  { %133 = shalt.err (!%p130_p12)
}
 0x157   :  { %s134_s24 = scalar_lea.hbm %s193_s1, 512 }
 0x158   :  { %p135_p13 = scmp.ne.s32.totalorder %s193_s1, %s134_s24  ;;  %p138_p0 = scmp.lt.u32.totalorder %s134_s24, %s193_s1 }
 0x15a   :  { %p140_p1 = pnand %p138_p0, %p135_p13 }
 0x15c   :  { %143 = shalt.err (!%p140_p1)
}
 0x15d   :  { %78 = dma.vmem_to_hbm [thread:$0]  %s73_s20, 512, %s193_s1, [#allocation4], %s149_s16, %s149_s16, %s150_s17  }
 0x15e   :  { %146 = dma.done.wait [#allocation4], 512  }
 0x15f   :  { %147 = vsyncadd [#allocation4], 4294966784 }
 0x160   :  { %82 = vsyncpa [#allocation3], 1 }
 0x161   :  { %83 = vsyncpa [#allocation4], 1 }

</bundles_post_ra>
